<compile_context>
chip_gen: v7x
topology: tpu7x:2x2x1
jax: 0.10.0
libtpu: 0.0.40
codegen_flags: <defaults>
</compile_context>

<pallas_src>
import functools

import jax
import jax.numpy as jnp
from jax import lax
from jax.experimental import pallas as pl
from jax.experimental.pallas import tpu as pltpu


def _round_up(x, m):
    return (x + m - 1) // m * m


def conv1d_kernel(x_ref, w_ref, b_ref, o_ref, *, kernel_size, stride, dilation,
                  l_out, tb):
    """Conv1d over TB batch elements as a single MXU matmul.

    x_ref: (TB, stride, phase_len_p, Cin_p) bf16 -- channels-last, zero-padded,
           pre-split into `stride` phases so each tap is a contiguous row window.
    w_ref: (K*Cin_p, Cout_p) bf16 -- taps folded into the contraction dim.
    b_ref: (1, Cout_p) f32 bias (zeros if the module has bias=False).
    o_ref: (TB, l_out, Cout_p) f32 channels-last output.
    """
    taps = []
    for k in range(kernel_size):                      # static unroll over taps
        pk = (k * dilation) % stride                  # which phase (static int)
        ok = (k * dilation) // stride                 # contiguous offset in phase
        taps.append(x_ref[:, pk, pl.ds(ok, l_out), :])        # (TB, l_out, Cin_p)

    # Fold K into the MXU contraction: lane-aligned concat -> one tall matmul.
    lhs = jnp.concatenate(taps, axis=-1)                       # (TB, l_out, K*Cin_p)
    kcin = lhs.shape[-1]
    lhs = lhs.reshape(tb * l_out, kcin)                        # tall LHS feeds MXU

    out = jnp.dot(lhs, w_ref[...], preferred_element_type=jnp.float32)
    out = out + b_ref[...]                                     # bias added once
    o_ref[...] = out.reshape(tb, l_out, -1).astype(o_ref.dtype)


def conv_norm_forward(signal, weight, bias=None, *, stride=1, padding=None, dilation=1):
    """ConvNorm.forward: Conv1d(signal). signal (B, C_in, L) -> (B, C_out, L_out)."""
    B, c_in, L = signal.shape
    c_out, _, K = weight.shape
    if padding is None:
        assert K % 2 == 1
        padding = int(dilation * (K - 1) // 2)

    l_out = (L + 2 * padding - dilation * (K - 1) - 1) // stride + 1
    assert l_out >= 1

    # Lane alignment: contraction 128-aligned; output 256-aligned on the 256-wide
    # MXUs when C_out is already >= 256, else 128.
    cin_p = _round_up(c_in, 128)
    cout_p = _round_up(c_out, 256 if c_out >= 256 else 128)

    # Phase-split geometry (so stride>1 taps are contiguous sublane reads).
    off_max = (dilation * (K - 1)) // stride
    phase_len_p = _round_up(l_out + off_max, 8)       # sublane-aligned phase length
    time_buf = stride * phase_len_p

    # Batch-row batching: target >=256 matmul rows when l_out is short.  The
    # leading-dim merge reshape is layout-free when l_out is a multiple of 8.
    tb = max(1, min(B, 256 // max(l_out, 1))) if (l_out % 8 == 0) else 1
    b_pad = _round_up(B, tb)

    # channels-last bf16 signal, zero-padded, phase-split:
    #   (B, C_in, L) -> (Bp, stride, phase_len_p, Cin_p)
    x = jnp.transpose(signal, (0, 2, 1)).astype(jnp.bfloat16)
    x = jnp.pad(x, ((0, b_pad - B),
                    (padding, max(0, time_buf - padding - L)),
                    (0, cin_p - c_in)))
    x = x[:, :time_buf]
    x = x.reshape(b_pad, phase_len_p, stride, cin_p).transpose(0, 2, 1, 3)

    # Weight pre-transposed/padded, taps folded into rows: (K*Cin_p, Cout_p), bf16.
    w = jnp.transpose(weight, (2, 1, 0)).astype(jnp.bfloat16)
    w = jnp.pad(w, ((0, 0), (0, cin_p - c_in), (0, cout_p - c_out)))
    w = w.reshape(K * cin_p, cout_p)

    if bias is None:
        b = jnp.zeros((c_out,), jnp.float32)
    else:
        b = bias.astype(jnp.float32)
    b = jnp.pad(b, (0, cout_p - c_out)).reshape(1, cout_p)

    # Explicit VMEM budget: bf16 x double-buffered, bf16 w single-buffered,
    # f32 out double-buffered, plus headroom for internal scratch.
    vmem_bytes = (2 * (tb * stride * phase_len_p * cin_p) * 2
                  + K * cin_p * cout_p * 2
                  + cout_p * 4
                  + 2 * (tb * l_out * cout_p) * 4
                  + (8 << 20))
    vmem_bytes = int(min(max(vmem_bytes, 16 << 20), 100 << 20))

    kernel = functools.partial(
        conv1d_kernel, kernel_size=K, stride=stride, dilation=dilation,
        l_out=l_out, tb=tb)

    out = pl.pallas_call(
        kernel,
        out_shape=jax.ShapeDtypeStruct((b_pad, l_out, cout_p), jnp.float32),
        grid=(b_pad // tb,),
        in_specs=[
            pl.BlockSpec((tb, stride, phase_len_p, cin_p), lambda g: (g, 0, 0, 0)),
            pl.BlockSpec((K * cin_p, cout_p), lambda g: (0, 0),
                         pipeline_mode=pl.Buffered(1)),
            pl.BlockSpec((1, cout_p), lambda g: (0, 0),
                         pipeline_mode=pl.Buffered(1)),
        ],
        out_specs=pl.BlockSpec((tb, l_out, cout_p), lambda g: (g, 0, 0)),
        compiler_params=pltpu.CompilerParams(
            dimension_semantics=("parallel",),
            vmem_limit_bytes=vmem_bytes),
    )(x, w, b)

    # Module contract is (B, C_out, L_out): drop batch/channel padding, transpose
    # back.  (Downstream consumers that accept channels-last could skip this.)
    return jnp.transpose(out[:B, :, :c_out], (0, 2, 1))


def init_conv_params(key, in_channels, out_channels, kernel_size, w_init_gain="linear"):
    """Mirror ConvNorm's init: xavier_normal_(gain) weight, default Conv1d bias."""
    kw, kb = jax.random.split(key)
    fan_in = in_channels * kernel_size
    fan_out = out_channels * kernel_size
    gain = 1.0 if w_init_gain == "linear" else 5.0 / 3.0   # 'tanh' gain
    std = gain * float(jnp.sqrt(2.0 / (fan_in + fan_out)))
    weight = jax.random.normal(kw, (out_channels, in_channels, kernel_size),
                               jnp.float32) * std
    bb = 1.0 / float(jnp.sqrt(jnp.float32(fan_in)))
    bias = jax.random.uniform(kb, (out_channels,), jnp.float32, -bb, bb)
    return weight, bias


def _reference_conv(signal, weight, bias, *, stride, padding, dilation):
    ref = lax.conv_general_dilated(
        signal, weight, window_strides=(stride,), padding=[(padding, padding)],
        rhs_dilation=(dilation,), dimension_numbers=("NCH", "OIH", "NCH"))
    return ref + bias[None, :, None]


if __name__ == "__main__":
    key = jax.random.PRNGKey(0)
    B, C_IN, L = 2, 4, 16
    C_OUT, K = 8, 3                 # odd kernel -> default padding = dilation*(K-1)/2

    k_sig, k_par = jax.random.split(key)
    signal = jax.random.normal(k_sig, (B, C_IN, L), jnp.float32)
    weight, bias = init_conv_params(k_par, C_IN, C_OUT, K, w_init_gain="linear")

    # bf16 inputs vs fp32 reference -> relaxed tolerance (f32 accumulation kept).
    TOL = dict(atol=2e-2, rtol=2e-2)

    # 1) default ConvNorm config (stride=1, dilation=1, 'same' padding)
    out = conv_norm_forward(signal, weight, bias, stride=1, padding=None, dilation=1)
    jax.block_until_ready(out)
    ref = _reference_conv(signal, weight, bias, stride=1, padding=1, dilation=1)
    assert out.shape == (B, C_OUT, L)
    assert bool(jnp.allclose(out, ref, **TOL))

    # 2) strided conv (exercises the phase-split path)
    out_s = conv_norm_forward(signal, weight, bias, stride=2, padding=None, dilation=1)
    jax.block_until_ready(out_s)
    ref_s = _reference_conv(signal, weight, bias, stride=2, padding=1, dilation=1)
    assert out_s.shape == ref_s.shape
    assert bool(jnp.allclose(out_s, ref_s, **TOL))

    # 3) dilated conv
    out_d = conv_norm_forward(signal, weight, bias, stride=1, padding=None, dilation=2)
    jax.block_until_ready(out_d)
    ref_d = _reference_conv(signal, weight, bias, stride=1, padding=2, dilation=2)
    assert out_d.shape == ref_d.shape
    assert bool(jnp.allclose(out_d, ref_d, **TOL))

    print("KERNEL_OK")
</pallas_src>

<mosaic_0001>
module attributes {stable_mosaic.version = 11 : i64} {
  func.func @conv1d_kernel(%arg0: i32, %arg1: memref<2x1x24x128xbf16, #tpu.memory_space<vmem>>, %arg2: memref<384x128xbf16, #tpu.memory_space<vmem>>, %arg3: memref<1x128xf32, #tpu.memory_space<vmem>>, %arg4: memref<2x16x128xf32, #tpu.memory_space<vmem>>) attributes {dimension_semantics = [#tpu.dimension_semantics<parallel>], iteration_bounds = array<i64: 1>, scalar_prefetch = 0 : i64, scratch_operands = 0 : i64, tpu.core_type = #tpu.core_type<tc>, window_params = [{transform_indices = @transform_0, window_bounds = array<i64: 2, 1, 24, 128>}, {pipeline_mode = #tpu.pipeline_mode<synchronous>, transform_indices = @transform_1, window_bounds = array<i64: 384, 128>}, {pipeline_mode = #tpu.pipeline_mode<synchronous>, transform_indices = @transform_2, window_bounds = array<i64: 1, 128>}, {transform_indices = @transform_3, window_bounds = array<i64: 2, 16, 128>}]} {
    %c0 = arith.constant 0 : index
    %c0_0 = arith.constant 0 : index
    %c0_1 = arith.constant 0 : index
    %c0_2 = arith.constant 0 : index
    %0 = vector.load %arg1[%c0, %c0_0, %c0_1, %c0_2] : memref<2x1x24x128xbf16, #tpu.memory_space<vmem>>, vector<2x1x16x128xbf16>
    %1 = vector.shape_cast %0 : vector<2x1x16x128xbf16> to vector<2x16x128xbf16>
    %c0_3 = arith.constant 0 : index
    %c0_4 = arith.constant 0 : index
    %c1 = arith.constant 1 : index
    %c0_5 = arith.constant 0 : index
    %2 = vector.load %arg1[%c0_3, %c0_4, %c1, %c0_5] : memref<2x1x24x128xbf16, #tpu.memory_space<vmem>>, vector<2x1x16x128xbf16>
    %3 = vector.shape_cast %2 : vector<2x1x16x128xbf16> to vector<2x16x128xbf16>
    %c0_6 = arith.constant 0 : index
    %c0_7 = arith.constant 0 : index
    %c2 = arith.constant 2 : index
    %c0_8 = arith.constant 0 : index
    %4 = vector.load %arg1[%c0_6, %c0_7, %c2, %c0_8] : memref<2x1x24x128xbf16, #tpu.memory_space<vmem>>, vector<2x1x16x128xbf16>
    %5 = vector.shape_cast %4 : vector<2x1x16x128xbf16> to vector<2x16x128xbf16>
    %6 = tpu.concatenate %1, %3, %5 in 2 : vector<2x16x128xbf16>, vector<2x16x128xbf16>, vector<2x16x128xbf16> -> vector<2x16x384xbf16>
    %7 = vector.shape_cast %6 : vector<2x16x384xbf16> to vector<32x384xbf16>
    %c0_9 = arith.constant 0 : index
    %c0_10 = arith.constant 0 : index
    %8 = vector.load %arg2[%c0_9, %c0_10] : memref<384x128xbf16, #tpu.memory_space<vmem>>, vector<384x128xbf16>
    %cst = arith.constant dense<0.000000e+00> : vector<32x128xf32>
    %9 = tpu.matmul %7, %8, %cst {dimension_numbers = #tpu.dot_dimension_numbers<[1], [0], [0], [1], [0, 0, 1, 1], [], []>} : vector<32x384xbf16>, vector<384x128xbf16>, vector<32x128xf32> -> vector<32x128xf32>
    %c0_11 = arith.constant 0 : index
    %c0_12 = arith.constant 0 : index
    %10 = vector.load %arg3[%c0_11, %c0_12] : memref<1x128xf32, #tpu.memory_space<vmem>>, vector<1x128xf32>
    %11 = vector.broadcast %10 : vector<1x128xf32> to vector<32x128xf32>
    %12 = arith.addf %9, %11 : vector<32x128xf32>
    %13 = vector.shape_cast %12 : vector<32x128xf32> to vector<2x16x128xf32>
    %c0_13 = arith.constant 0 : index
    %c0_14 = arith.constant 0 : index
    %c0_15 = arith.constant 0 : index
    %14 = vector.load %arg4[%c0_13, %c0_14, %c0_15] : memref<2x16x128xf32, #tpu.memory_space<vmem>>, vector<2x16x128xf32>
    tpu.vector_store %arg4[%c0_13, %c0_14, %c0_15], %13 {strides = array<i32>} : memref<2x16x128xf32, #tpu.memory_space<vmem>>, vector<2x16x128xf32>,
    return
  }
  func.func @transform_0(%arg0: i32) -> (i32, i32, i32, i32) {
    %c0_i32 = arith.constant 0 : i32
    %c0_i32_0 = arith.constant 0 : i32
    %c0_i32_1 = arith.constant 0 : i32
    %c0_i32_2 = arith.constant 0 : i32
    return %arg0, %c0_i32, %c0_i32_0, %c0_i32_1 : i32, i32, i32, i32
  }
  func.func @transform_1(%arg0: i32) -> (i32, i32) {
    %c0_i32 = arith.constant 0 : i32
    %c0_i32_0 = arith.constant 0 : i32
    %c0_i32_1 = arith.constant 0 : i32
    return %c0_i32, %c0_i32_0 : i32, i32
  }
  func.func @transform_2(%arg0: i32) -> (i32, i32) {
    %c0_i32 = arith.constant 0 : i32
    %c0_i32_0 = arith.constant 0 : i32
    %c0_i32_1 = arith.constant 0 : i32
    return %c0_i32, %c0_i32_0 : i32, i32
  }
  func.func @transform_3(%arg0: i32) -> (i32, i32, i32) {
    %c0_i32 = arith.constant 0 : i32
    %c0_i32_0 = arith.constant 0 : i32
    %c0_i32_1 = arith.constant 0 : i32
    return %arg0, %c0_i32, %c0_i32_0 : i32, i32, i32
  }
}

</mosaic_0001>

<bundles_post_ra>
// kernel: tpu_custom_call.1
= control target key start
LH: loop header
LB: loop body
LE: loop exit
PB: predicated region body
PF: predicated region fallthrough
CT: control target
= control target key end

     0   :  { %8 = vsyncpa [#allocation3], 0  ;;  %s717_s0 = inlined_call_operand.hbm [shape: bf16[2,1,24,128], index: 0, kind: input, shape index: {}]   ;;  %s718_s1 = inlined_call_operand.hbm [shape: bf16[384,128], index: 1, kind: input, shape index: {}]   ;;  %s719_s2 = inlined_call_operand.vmem [shape: f32[1,128], index: 2, kind: input, shape index: {}]   ;;  %s720_s3 = inlined_call_operand.hbm [shape: f32[2,16,128], index: 3, kind: output, shape index: {}]  }
   0x1   :  { %9 = vsyncpa [#allocation6], 0 }
   0x2   :  { %10 = vsyncpa [#allocation4], 0  ;;  %s647_s12 = smov [#allocation2]   ;;  %s575_s16 = scalar_lea.hbm %s717_s0, 384 }
   0x3   :  { %s16_s13 = sshll.u32 %s647_s12, 4  ;;  %p576_p0 = scmp.ne.s32.totalorder %s717_s0, %s575_s16  ;;  %s17_s13 = int_to_ptr.vmem [resolvable:$true] %s16_s13 }
   0x4   :  { %p579_p1 = scmp.lt.u32.totalorder %s575_s16, %s717_s0 }
   0x6   :  { %p581_p2 = pnand %p579_p1, %p576_p0 }
   0x8   :  { %584 = shalt.err (!%p581_p2)
}
   0x9   :  { %s585_s21 = scalar_lea.vmem %s17_s13, 384  ;;  %p590_p4 = scmp.lt.s32.totalorder %s17_s13, %s17_s13 }
   0xa   :  { %p586_p3 = scmp.ne.s32.totalorder %s17_s13, %s585_s21  ;;  %p591_p5 = scmp.lt.s32.totalorder %s585_s21, %s585_s21 }
   0xc   :  { %p592_p6 = por %p591_p5, %p590_p4 }
   0xe   :  { %p593_p7 = pnand %p592_p6, %p586_p3 }
  0x10   :  { %596 = shalt.err (!%p593_p7)
}
  0x11   :  { %s648_s22 = smov 64   ;;  %s649_s23 = smov 4  }
  0x12   :  { %22 = dma.hbm_to_vmem [thread:$0]  %s717_s0, 384, %s17_s13, [#allocation3], %s648_s22, %s648_s22, %s649_s23  }
  0x13   :  { %s650_s26 = smov [#allocation5]   ;;  %s597_s30 = scalar_lea.hbm %s718_s1, 3072 }
  0x14   :  { %s28_s27 = sshll.u32 %s650_s26, 4  ;;  %p598_p8 = scmp.ne.s32.totalorder %s718_s1, %s597_s30  ;;  %s29_s27 = int_to_ptr.vmem [resolvable:$true] %s28_s27 }
  0x15   :  { %p601_p9 = scmp.lt.u32.totalorder %s597_s30, %s718_s1 }
  0x17   :  { %p603_p10 = pnand %p601_p9, %p598_p8 }
  0x19   :  { %606 = shalt.err (!%p603_p10)
}
  0x1a   :  { %s607_s8 = scalar_lea.vmem %s29_s27, 3072  ;;  %p612_p12 = scmp.lt.s32.totalorder %s29_s27, %s29_s27 }
  0x1b   :  { %p608_p11 = scmp.ne.s32.totalorder %s29_s27, %s607_s8  ;;  %p613_p13 = scmp.lt.s32.totalorder %s607_s8, %s607_s8 }
  0x1d   :  { %p614_p0 = por %p613_p13, %p612_p12 }
  0x1f   :  { %p615_p1 = pnand %p614_p0, %p608_p11 }
  0x21   :  { %618 = shalt.err (!%p615_p1)
}
  0x22   :  { %34 = dma.hbm_to_vmem [thread:$0]  %s718_s1, 3072, %s29_s27, [#allocation6], %s648_s22, %s648_s22, %s649_s23  }
  0x23   :  { %641 = dma.done.wait [#allocation3], 384  }
  0x24   :  { %642 = vsyncadd [#allocation3], 4294966912 }
  0x25   :  { %643 = dma.done.wait [#allocation6], 3072  }
  0x26   :  { %644 = vsyncadd [#allocation6], 4294964224  ;;  %v543_v0 = vld [vmem:[#allocation5 + $0x40] sm:$0xff]   ;;  %v545_v2 = vld [vmem:[#allocation5 + $0x48] sm:$0xff]   ;;  %vm84_vm0 = vsmask.f32 7424 }
  0x27   :  { %v544_v1 = vld [vmem:[#allocation5] sm:$0xff]   ;;  %478 = vmatprep.subr.bf16.mxu0 %v543_v0  ;;  %v547_v4 = vld [vmem:[#allocation5 + $0x8] sm:$0xff]   ;;  %v548_v5 = vld [vmem:[#allocation5 + $0x50] sm:$0xff]   ;;  %vm117_vm1 = vcmask 1046528  }
  0x28   :  { %479 = vmatpush3.bf16.msra.mxu0 %v544_v1  ;;  %v546_v3 = vld [vmem:[#allocation5 + $0x80] sm:$0xff]   ;;  %v549_v6 = vld [vmem:[#allocation5 + $0x88] sm:$0xff]   ;;  %v550_v7 = vld [vmem:[#allocation5 + $0x10] sm:$0xff]  }
  0x29   :  { %480 = vmatprep.subr.bf16.mxu0 %v545_v2  ;;  %516 = vmatprep.subr.bf16.mxu1 %v546_v3  ;;  %v551_v8 = vld [vmem:[#allocation5 + $0x58] sm:$0xff]   ;;  %v552_v9 = vld [vmem:[#allocation5 + $0x90] sm:$0xff]   ;;  %v554_v11 = vld [vmem:[#allocation5 + $0x60] sm:$0xff]  }
  0x2a   :  { %517 = vmatpush3.bf16.msra.mxu1 %v546_v3  ;;  %v553_v10 = vld [vmem:[#allocation5 + $0x18] sm:$0xff]   ;;  %v556_v13 = vld [vmem:[#allocation5 + $0x20] sm:$0xff]   ;;  %v557_v15 = vld [vmem:[#allocation5 + $0x68] sm:$0xff]  }
  0x2b   :  { %518 = vmatprep.subr.bf16.mxu1 %v549_v6  ;;  %v555_v12 = vld [vmem:[#allocation5 + $0x98] sm:$0xff]   ;;  %v558_v14 = vld [vmem:[#allocation5 + $0xa0] sm:$0xff]   ;;  %v559_v16 = vld [vmem:[#allocation5 + $0x28] sm:$0xff]  }
  0x2c   :  { %481 = vmatpush3.bf16.msra.mxu0 %v547_v4  ;;  %v561_v17 = vld [vmem:[#allocation5 + $0xa8] sm:$0xff]   ;;  %v560_v18 = vld [vmem:[#allocation5 + $0x70] sm:$0xff]   ;;  %v563_v23 = vld [vmem:[#allocation5 + $0x78] sm:$0xff]  }
  0x2d   :  { %482 = vmatprep.subr.bf16.mxu0 %v548_v5  ;;  %v562_v19 = vld [vmem:[#allocation5 + $0x30] sm:$0xff]   ;;  %v48_v21 = vld [vmem:[#allocation2] sm:$0xf]  ;;  %v49_v22 = vld [vmem:[#allocation2 + $0x4] sm:$0xf] }
  0x2e   :  { %519 = vmatpush3.bf16.msra.mxu1 %v549_v6  ;;  %v564_v20 = vld [vmem:[#allocation5 + $0xb0] sm:$0xff]   ;;  %v447_v24 = vcombine.low %v48_v21, %v49_v22  ;;  %v565_v26 = vld [vmem:[#allocation5 + $0x38] sm:$0xff]   ;;  %v54_v30 = vld [vmem:[#allocation2] sm:$0xe] }
  0x2f   :  { %520 = vmatprep.subr.bf16.mxu1 %v552_v9  ;;  %v567_v25 = vld [vmem:[#allocation2 + $0x8] ss:$0 sps:$4 sm:$0x11]   ;;  %v569_v31 = vld [vmem:[#allocation5 + $0xb8] sm:$0xff]   ;;  %v451_v32 = vcombine.low %v54_v30, %v49_v22  ;;  %v51_v34 = vld [vmem:[#allocation2 + $0xc] sm:$0xf] }
  0x30   :  { %483 = vmatpush3.bf16.msra.mxu0 %v550_v7  ;;  %v86_v27 = vshrl.u32 %v447_v24, 16  ;;  %v88_v28 = vshll.u32 %v447_v24, 16  ;;  %v93_v29 = vshll.u32 %v567_v25, 16  ;;  %v119_v33 = vrot.slane %v567_v25, 1  ;;  %v52_v35 = vld [vmem:[#allocation2 + $0x10] sm:$0xf] }
  0x31   :  { %484 = vmatprep.subr.bf16.mxu0 %v551_v8  ;;  %v55_v38 = vld [vmem:[#allocation2 + $0xc] sm:$0xe]  ;;  %v449_v39 = vcombine.low %v51_v34, %v52_v35  ;;  %v118_v40 = vrot.slane %v451_v32, 1  ;;  %v572_v41 = vld [vmem:[#allocation2 + $0x14] ss:$0 sps:$4 sm:$0x11]  }
  0x32   :  { %521 = vmatpush3.bf16.msra.mxu1 %v552_v9  ;;  %v90_v36 = vrot.slane %v88_v28, 1  ;;  %v95_v37 = vrot.slane %v93_v29, 1  ;;  %v452_v42 = vcombine.low %v55_v38, %v52_v35  ;;  %v568_v44 = vld [vmem:[#allocation2] sm:$0xff]   ;;  %v122_v49 = vrot.slane %v572_v41, 1  ;;  %v574_v57 = vld [vmem:[#allocation2 + $0xc] sm:$0xff]  }
  0x33   :  { %522 = vmatprep.subr.bf16.mxu1 %v555_v12  ;;  %v98_v45 = vshrl.u32 %v449_v39, 16  ;;  %v100_v46 = vshll.u32 %v449_v39, 16  ;;  %v120_v47 = vsel %vm117_vm1, %v118_v40, %v119_v33  ;;  %v105_v50 = vshll.u32 %v572_v41, 16  ;;  %v453_v60 = vld [vmem:[%s719_s2] ss:$0 sm:$0xff]  ;;  %s651_s2 = smov [#allocation7]  }
  0x34   :  { %485 = vmatpush3.bf16.msra.mxu0 %v553_v10  ;;  %v91_v43 = vor.u32 %v90_v36, %v86_v27  ;;  %v121_v48 = vrot.slane %v452_v42, 1  ;;  %532 = vmatprep.mubr.bf16.mxu1 %v120_v47  ;;  %s432_s11 = sshll.u32 %s651_s2, 4  ;;  %s433_s11 = int_to_ptr.vmem [resolvable:$true] %s432_s11 }
  0x35   :  { %486 = vmatprep.subr.bf16.mxu0 %v554_v11  ;;  %v102_v52 = vrot.slane %v100_v46, 1  ;;  %v107_v53 = vrot.slane %v105_v50, 1  ;;  %s619_s12 = scalar_lea.vmem %s433_s11, 512  ;;  %p624_p3 = scmp.lt.s32.totalorder %s433_s11, %s433_s11 }
  0x36   :  { %523 = vmatpush3.bf16.msra.mxu1 %v555_v12  ;;  %v96_v51 = vsel %vm84_vm0, %v91_v43, %v95_v37  ;;  %v123_v54 = vsel %vm117_vm1, %v121_v48, %v122_v49  ;;  %p620_p2 = scmp.ne.s32.totalorder %s433_s11, %s619_s12  ;;  %p625_p4 = scmp.lt.s32.totalorder %s619_s12, %s619_s12 }
  0x37   :  { %524 = vmatprep.subr.bf16.mxu1 %v558_v14  ;;  %357 = vmatprep.mubr.bf16.mxu0 %v96_v51  ;;  %v103_v55 = vor.u32 %v102_v52, %v98_v45 }
  0x38   :  { %487 = vmatpush3.bf16.msra.mxu0 %v556_v13  ;;  %p626_p5 = por %p625_p4, %p624_p3 }
  0x39   :  { %488 = vmatprep.subr.bf16.mxu0 %v557_v15  ;;  %v108_v56 = vsel %vm84_vm0, %v103_v55, %v107_v53 }
  0x3a   :  { %525 = vmatpush3.bf16.msra.mxu1 %v558_v14  ;;  %p627_p6 = pnand %p626_p5, %p620_p2 }
  0x3b   :  { %526 = vmatprep.subr.bf16.mxu1 %v561_v17 }
  0x3c   :  { %489 = vmatpush3.bf16.msra.mxu0 %v559_v16 }
  0x3d   :  { %490 = vmatprep.subr.bf16.mxu0 %v560_v18 }
  0x3e   :  { %527 = vmatpush3.bf16.msra.mxu1 %v561_v17 }
  0x3f   :  { %528 = vmatprep.subr.bf16.mxu1 %v564_v20 }
  0x40   :  { %491 = vmatpush3.bf16.msra.mxu0 %v562_v19 }
  0x41   :  { %492 = vmatprep.subr.bf16.mxu0 %v563_v23 }
  0x42   :  { %529 = vmatpush3.bf16.msra.mxu1 %v564_v20 }
  0x43   :  { %530 = vmatprep.subr.bf16.mxu1 %v569_v31 }
  0x44   :  { %493 = vmatpush3.bf16.msra.mxu0 %v565_v26 }
  0x46   :  { %531 = vmatpush3.bf16.msra.mxu1 %v569_v31 }
  0x47   :  { %358 = vmatmul.mubr.bf16.vlgmr.msra.gmra.mrb[0].mxu0 %v568_v44 }
  0x48   :  { %365 = vmatprep.mubr.bf16.mxu0 %v108_v56 }
  0x49   :  { %533 = vmatmul.mubr.bf16.vlgmr.msra.gmra.mrb[0].mxu1 %v123_v54 }
  0x4f   :  { %366 = vmatmul.mubr.bf16.gmra.mrb[4].mxu0 %v574_v57 }
 0x11a   :  { %v494_v58 = vpop.f32.mrb[0].mxu0 }
 0x11b   :  { %v495_v59 = vpop.f32.mrb[1].mxu0 }
 0x11c   :  { %v496_v61 = vadd.f32 %v495_v59, %v494_v58  ;;  %v497_v62 = vpop.f32.mrb[2].mxu0  ;;  %v534_v0 = vpop.f32.mrb[0].mxu1 }
 0x11d   :  { %v498_v63 = vpop.f32.mrb[3].mxu0  ;;  %v408_v3 = vpop.f32.mrb[1].mxu1 }
 0x11e   :  { %v499_v1 = vadd.f32 %v498_v63, %v497_v62  ;;  %v360_v2 = vadd.f32 %v496_v61, %v453_v60  ;;  %v535_v4 = vpop.f32.mrb[2].mxu1 }
 0x11f   :  { %v411_v7 = vpop.f32.mrb[3].mxu1 }
 0x120   :  { %v409_v5 = vadd.f32 %v408_v3, %v360_v2  ;;  %v363_v6 = vadd.f32 %v499_v1, %v453_v60 }
 0x122   :  { %423 = vst [vmem:[#allocation7] sm:$0xff] %v409_v5  ;;  %v412_v8 = vadd.f32 %v411_v7, %v363_v6  ;;  %v500_v9 = vpop.f32.mrb[4].mxu0 }
 0x123   :  { %v501_v10 = vpop.f32.mrb[5].mxu0 }
 0x124   :  { %424 = vst [vmem:[#allocation7 + $0x8] sm:$0xff] %v412_v8  ;;  %v502_v11 = vadd.f32 %v501_v10, %v500_v9  ;;  %v503_v12 = vpop.f32.mrb[6].mxu0 }
 0x125   :  { %v504_v13 = vpop.f32.mrb[7].mxu0 }
 0x126   :  { %v368_v14 = vadd.f32 %v502_v11, %v453_v60  ;;  %v505_v15 = vadd.f32 %v504_v13, %v503_v12 }
 0x128   :  { %v417_v16 = vadd.f32 %v534_v0, %v368_v14  ;;  %v371_v17 = vadd.f32 %v505_v15, %v453_v60 }
 0x12a   :  { %425 = vst [vmem:[#allocation7 + $0x10] sm:$0xff] %v417_v16  ;;  %v420_v18 = vadd.f32 %v535_v4, %v371_v17 }
 0x12c   :  { %426 = vst [vmem:[#allocation7 + $0x18] sm:$0xff] %v420_v18 }
 0x12d   :  { %630 = shalt.err (!%p627_p6)
}
 0x12e   :  { %s631_s15 = scalar_lea.hbm %s720_s3, 512 }
 0x12f   :  { %p632_p7 = scmp.ne.s32.totalorder %s720_s3, %s631_s15  ;;  %p635_p8 = scmp.lt.u32.totalorder %s631_s15, %s720_s3 }
 0x131   :  { %p637_p9 = pnand %p635_p8, %p632_p7 }
 0x133   :  { %640 = shalt.err (!%p637_p9)
}
 0x134   :  { %s652_s20 = smov 128   ;;  %s653_s21 = smov 8  }
 0x135   :  { %438 = dma.vmem_to_hbm [thread:$0]  %s433_s11, 512, %s720_s3, [#allocation4], %s652_s20, %s652_s20, %s653_s21  }
 0x136   :  { %645 = dma.done.wait [#allocation4], 512  }
 0x137   :  { %646 = vsyncadd [#allocation4], 4294966784 }
 0x138   :  { %442 = vsyncpa [#allocation3], 1 }
 0x139   :  { %443 = vsyncpa [#allocation6], 1 }
 0x13a   :  { %444 = vsyncpa [#allocation4], 1 }

</bundles_post_ra>
